<compile_context>
chip_gen: v5e
topology: v5e:2x2
jax: 0.10.0
libtpu: 0.0.40
codegen_flags: <defaults>
</compile_context>

<pallas_src>
import functools

import jax
import jax.numpy as jnp
from jax.experimental import pallas as pl
from jax.experimental.pallas import tpu as pltpu


# ----------------------------------------------------------------------------
# Kernel
# ----------------------------------------------------------------------------
def _sentence_cnn_kernel(x_ref, w_ref, b_ref, out_ref, *, k_sizes):
    """x_ref: (TN, L, D) f32; w_ref: (Kmax*D, NB*Co) bf16; b_ref: (1, NB*Co) f32."""
    tn, L, D = x_ref.shape
    nb = len(k_sizes)
    Co = out_ref.shape[-1] // nb
    kmax = max(k_sizes)
    kmin = min(k_sizes)
    T = L - kmin + 1                       # positions for the smallest-K branch

    # In-kernel f32 -> bf16 cast (no separate XLA cast pass over x in HBM).
    xb = x_ref[...].astype(jnp.bfloat16)

    # Zero-pad the time axis so every tap slice has T rows; the padded rows only
    # multiply zero weight columns / get masked, so they never affect results.
    pad = (T + kmax - 1) - L
    if pad > 0:
        xb = jnp.concatenate(
            [xb, jnp.zeros((tn, pad, D), jnp.bfloat16)], axis=1)

    # im2col: taps folded into the contraction dim -> (tn, T, Kmax*D).
    x_shift = jnp.concatenate([xb[:, k:k + T, :] for k in range(kmax)], axis=2)

    # Single MXU matmul for every tap of every branch, f32 accumulate.
    p = jax.lax.dot_general(
        x_shift, w_ref[...],
        dimension_numbers=(((2,), (0,)), ((), ())),
        preferred_element_type=jnp.float32,
    )                                       # (tn, T, nb*Co) f32

    # Mask positions past each branch's valid length (larger K => fewer rows),
    # then take ONE max over time on the lane-contiguous slab.
    t_idx = jax.lax.broadcasted_iota(jnp.int32, (1, T, nb * Co), 1)
    c_idx = jax.lax.broadcasted_iota(jnp.int32, (1, T, nb * Co), 2)
    limit = jnp.full_like(c_idx, L - k_sizes[-1] + 1)
    for j in range(nb - 2, -1, -1):         # nb is tiny & static -> unrolled
        limit = jnp.where(c_idx < (j + 1) * Co, L - k_sizes[j] + 1, limit)
    p = jnp.where(t_idx < limit, p, -jnp.inf)

    # relu(max_t a_t + b) == max_t relu(a_t + b): bias is constant over time.
    o = jnp.maximum(jnp.max(p, axis=1) + b_ref[...], 0.0)   # (tn, nb*Co) f32

    # TODO(synk): training-mode dropout (p=0.5) would need pltpu.prng_*; inference = identity.
    # One contiguous 64-lane store instead of two 32-lane masked slice writes.
    out_ref[...] = o.astype(out_ref.dtype)


# ----------------------------------------------------------------------------
# Once-per-model parameter packing (hoisted out of the per-call path)
# ----------------------------------------------------------------------------
def pack_sentence_cnn_params(weights, biases, *, dtype=jnp.bfloat16):
    """weights: list of (K_i, D, Co) conv kernels; biases: list of (1, Co) or (Co,).

    Returns (w_pack, b_pack, k_sizes):
      w_pack: (Kmax*D, NB*Co) with tap k of branch j at rows [k*D:(k+1)*D],
              cols [j*Co:(j+1)*Co]; missing taps (K_j < Kmax) are zero.
      b_pack: (1, NB*Co) f32, branches concatenated in order (matches torch.cat).
    Call ONCE per model; the result is reused across all forward calls.
    """
    k_sizes = tuple(int(w.shape[0]) for w in weights)
    D, Co = int(weights[0].shape[1]), int(weights[0].shape[2])
    kmax = max(k_sizes)
    cols = []
    for w, K in zip(weights, k_sizes):
        blk = jnp.zeros((kmax, D, Co), jnp.float32).at[:K].set(
            w.astype(jnp.float32))
        cols.append(blk.reshape(kmax * D, Co))
    w_pack = jnp.concatenate(cols, axis=1).astype(dtype)          # (Kmax*D, NB*Co)
    b_pack = jnp.concatenate(
        [b.reshape(1, Co).astype(jnp.float32) for b in biases], axis=1)
    return w_pack, b_pack, k_sizes


# ----------------------------------------------------------------------------
# Wrapper
# ----------------------------------------------------------------------------
def _ceil_to(v, m):
    return ((v + m - 1) // m) * m


def sentence_encoding_cnn(x, w_pack, b_pack, k_sizes, *, tn=None,
                          out_dtype=jnp.float32):
    """x: (N, L, D) f32 (passed straight to the kernel, no wrapper cast)."""
    N, L, D = x.shape
    nb = len(k_sizes)
    kmax, kmin = max(k_sizes), min(k_sizes)
    if L < kmax:
        raise ValueError(
            f"sequence length {L} shorter than largest conv kernel {kmax}")
    co_total = int(b_pack.shape[-1])
    if w_pack.shape != (kmax * D, co_total):
        raise ValueError(f"w_pack shape {w_pack.shape} != {(kmax * D, co_total)}")
    T = L - kmin + 1

    # --- generation-aware VMEM budget (v7x has 64 MiB vs 128 MiB on v5e/v6e) ---
    try:
        vmem_cap = int(pltpu.get_tpu_info().vmem_capacity_bytes)
    except Exception:
        vmem_cap = 64 * 1024 * 1024                     # conservative fallback
    tile_budget = min(vmem_cap // 3, 48 * 1024 * 1024)
    vmem_limit = int(min(vmem_cap * 3 // 4, 64 * 1024 * 1024))

    # Rough per-batch-row VMEM footprint of one grid step.
    per_row = (L * D * 4) * 2          # f32 x tile, double-buffered by Pallas
    per_row += (T * kmax * D) * 2      # bf16 im2col scratch
    per_row += (T * co_total) * 4 * 2  # f32 matmul result + masked copy
    per_row += co_total * 4 * 2        # output tile, double-buffered
    cap = max(8, min(2048, (tile_budget // max(per_row, 1)) // 8 * 8))

    # --- batch tile: multiple of 8 (or == N), big enough to amortize the
    #     ~0.35 us per-grid-step overhead, but keep >= 2 grid steps when N
    #     permits so v7x's two TensorCores both get work. ---
    if tn is None:
        if N <= 8:
            tn = N
        else:
            tn = min(cap, N if N % 8 == 0 else (N // 8) * 8)
            if N >= 16:
                tn = min(tn, _ceil_to(pl.cdiv(N, 2), 8))
            tn = max(tn, 8)
    elif tn != N and tn % 8 != 0:
        raise ValueError("tn must be a multiple of 8 or equal to the batch size N")

    grid = (pl.cdiv(N, tn),)
    kernel = functools.partial(_sentence_cnn_kernel, k_sizes=tuple(k_sizes))

    flops = 2 * N * T * (kmax * D) * co_total
    bytes_accessed = (x.size * x.dtype.itemsize
                      + w_pack.size * w_pack.dtype.itemsize
                      + b_pack.size * 4
                      + N * co_total * jnp.dtype(out_dtype).itemsize)

    return pl.pallas_call(
        kernel,
        out_shape=jax.ShapeDtypeStruct((N, co_total), out_dtype),
        grid=grid,
        in_specs=[
            pl.BlockSpec((tn, L, D), lambda i: (i, 0, 0)),     # x tile (f32), pipelined
            pl.BlockSpec(w_pack.shape, lambda i: (0, 0)),      # pinned packed weights (bf16)
            pl.BlockSpec(b_pack.shape, lambda i: (0, 0)),      # pinned packed biases (f32)
        ],
        out_specs=pl.BlockSpec((tn, co_total), lambda i: (i, 0)),
        compiler_params=pltpu.CompilerParams(
            dimension_semantics=("parallel",),                 # batch axis -> megacore/TCs
            vmem_limit_bytes=vmem_limit,
        ),
        cost_estimate=pl.CostEstimate(
            flops=flops, transcendentals=0, bytes_accessed=bytes_accessed),
    )(x, w_pack, b_pack)


# ----------------------------------------------------------------------------
# Pure-JAX reference (conv-as-shifted-matmul); optionally mirrors the bf16 MXU cast.
# ----------------------------------------------------------------------------
def _reference(x, weights, biases, matmul_dtype=jnp.float32):
    outs = []
    for w, b in zip(weights, biases):
        K = w.shape[0]
        T = x.shape[1] - K + 1
        acc = sum(
            jnp.einsum("ntd,dc->ntc",
                       x[:, k:k + T, :].astype(matmul_dtype),
                       w[k].astype(matmul_dtype),
                       preferred_element_type=jnp.float32)
            for k in range(K))
        outs.append(jnp.maximum(jnp.max(acc, axis=1) + b.reshape(1, -1), 0.0))
    return jnp.concatenate(outs, axis=1)


if __name__ == "__main__":
    # Small shapes consistent with the module: N=2, seq L=8, embed D=32, Co=32, Ks=[2,3]
    N, L, D, Co = 2, 8, 32, 32
    key = jax.random.PRNGKey(0)
    kx, kw2, kb2, kw3, kb3, kx2 = jax.random.split(key, 6)

    x = jax.random.normal(kx, (N, L, D), dtype=jnp.float32)
    # Conv2d(1, Co, (K, D)) weights stored as (K, D, Co), bias as (1, Co).
    w2 = jax.random.normal(kw2, (2, D, Co), dtype=jnp.float32) * 0.1
    b2 = jax.random.normal(kb2, (1, Co), dtype=jnp.float32) * 0.1
    w3 = jax.random.normal(kw3, (3, D, Co), dtype=jnp.float32) * 0.1
    b3 = jax.random.normal(kb3, (1, Co), dtype=jnp.float32) * 0.1

    # Pack parameters ONCE per model (hoisted out of the per-call path).
    w_pack, b_pack, k_sizes = pack_sentence_cnn_params([w2, w3], [b2, b3])

    out = jax.block_until_ready(sentence_encoding_cnn(x, w_pack, b_pack, k_sizes))
    assert out.shape == (N, 2 * Co), out.shape

    # Tight check vs a reference that mirrors the bf16 MXU inputs (same math as kernel).
    ref_bf16 = _reference(x, [w2, w3], [b2, b3], matmul_dtype=jnp.bfloat16)
    assert jnp.allclose(out, ref_bf16, atol=1e-4, rtol=1e-4), \
        "mismatch vs bf16-matmul reference"

    # Loose sanity check vs the full-f32 PyTorch-equivalent math.
    ref_f32 = _reference(x, [w2, w3], [b2, b3], matmul_dtype=jnp.float32)
    assert jnp.allclose(out, ref_f32, atol=3e-2, rtol=3e-2), \
        "mismatch vs f32 reference"

    # Exercise the multi-step grid + partial last batch tile path (tn=16, grid=2).
    x_big = jax.random.normal(kx2, (20, L, D), dtype=jnp.float32)
    out_big = jax.block_until_ready(
        sentence_encoding_cnn(x_big, w_pack, b_pack, k_sizes))
    ref_big = _reference(x_big, [w2, w3], [b2, b3], matmul_dtype=jnp.bfloat16)
    assert out_big.shape == (20, 2 * Co), out_big.shape
    assert jnp.allclose(out_big, ref_big, atol=1e-4, rtol=1e-4), \
        "mismatch on multi-tile / partial-tile batch"

    print("KERNEL_OK")
</pallas_src>

<mosaic_0001>
module attributes {stable_mosaic.version = 11 : i64} {
  func.func @_sentence_cnn_kernel(%arg0: i32, %arg1: memref<2x8x32xf32, #tpu.memory_space<vmem>>, %arg2: memref<96x64xbf16, #tpu.memory_space<vmem>>, %arg3: memref<1x64xf32, #tpu.memory_space<vmem>>, %arg4: memref<2x64xf32, #tpu.memory_space<vmem>>) attributes {dimension_semantics = [#tpu.dimension_semantics<parallel>], iteration_bounds = array<i64: 1>, scalar_prefetch = 0 : i64, scratch_operands = 0 : i64, tpu.core_type = #tpu.core_type<tc>, window_params = [{transform_indices = @transform_0, window_bounds = array<i64: 2, 8, 32>}, {pipeline_mode = #tpu.pipeline_mode<synchronous>, transform_indices = @transform_1, window_bounds = array<i64: 96, 64>}, {pipeline_mode = #tpu.pipeline_mode<synchronous>, transform_indices = @transform_2, window_bounds = array<i64: 1, 64>}, {transform_indices = @transform_3, window_bounds = array<i64: 2, 64>}]} {
    %c0 = arith.constant 0 : index
    %c0_0 = arith.constant 0 : index
    %c0_1 = arith.constant 0 : index
    %0 = vector.load %arg1[%c0, %c0_0, %c0_1] : memref<2x8x32xf32, #tpu.memory_space<vmem>>, vector<2x8x32xf32>
    %1 = arith.truncf %0 : vector<2x8x32xf32> to vector<2x8x32xbf16>
    %cst = arith.constant 0.000000e+00 : bf16
    %2 = vector.broadcast %cst : bf16 to vector<2x1x32xbf16>
    %3 = tpu.concatenate %1, %2 in 1 : vector<2x8x32xbf16>, vector<2x1x32xbf16> -> vector<2x9x32xbf16>
    %4 = vector.extract_strided_slice %3 {offsets = [0, 0, 0], sizes = [2, 7, 32], strides = [1, 1, 1]} : vector<2x9x32xbf16> to vector<2x7x32xbf16>
    %5 = vector.extract_strided_slice %3 {offsets = [0, 1, 0], sizes = [2, 7, 32], strides = [1, 1, 1]} : vector<2x9x32xbf16> to vector<2x7x32xbf16>
    %6 = vector.extract_strided_slice %3 {offsets = [0, 2, 0], sizes = [2, 7, 32], strides = [1, 1, 1]} : vector<2x9x32xbf16> to vector<2x7x32xbf16>
    %7 = tpu.concatenate %4, %5, %6 in 2 : vector<2x7x32xbf16>, vector<2x7x32xbf16>, vector<2x7x32xbf16> -> vector<2x7x96xbf16>
    %c0_2 = arith.constant 0 : index
    %c0_3 = arith.constant 0 : index
    %8 = vector.load %arg2[%c0_2, %c0_3] : memref<96x64xbf16, #tpu.memory_space<vmem>>, vector<96x64xbf16>
    %cst_4 = arith.constant dense<0.000000e+00> : vector<2x7x64xf32>
    %9 = tpu.matmul %7, %8, %cst_4 {dimension_numbers = #tpu.dot_dimension_numbers<[2], [0], [0, 1], [1], [0, 0, 0, 1, 1, 1], [], []>} : vector<2x7x96xbf16>, vector<96x64xbf16>, vector<2x7x64xf32> -> vector<2x7x64xf32>
    %10 = tpu.iota {dimensions = array<i32: 1>} : vector<1x7x64xi32>
    %11 = tpu.iota {dimensions = array<i32: 2>} : vector<1x7x64xi32>
    %c6_i32 = arith.constant 6 : i32
    %12 = vector.broadcast %c6_i32 : i32 to vector<1x7x64xi32>
    %c32_i32 = arith.constant 32 : i32
    %13 = vector.broadcast %c32_i32 : i32 to vector<1x7x64xi32>
    %14 = arith.cmpi slt, %11, %13 : vector<1x7x64xi32>
    %c7_i32 = arith.constant 7 : i32
    %15 = vector.broadcast %c7_i32 : i32 to vector<1x7x64xi32>
    %16 = arith.select %14, %15, %12 : vector<1x7x64xi1>, vector<1x7x64xi32>
    %17 = arith.cmpi slt, %10, %16 : vector<1x7x64xi32>
    %cst_5 = arith.constant 0xFF800000 : f32
    %18 = vector.shape_cast %17 : vector<1x7x64xi1> to vector<1x7x64xi1>
    %19 = vector.broadcast %18 : vector<1x7x64xi1> to vector<2x7x64xi1>
    %20 = vector.broadcast %cst_5 : f32 to vector<2x7x64xf32>
    %21 = arith.select %19, %9, %20 : vector<2x7x64xi1>, vector<2x7x64xf32>
    %cst_6 = arith.constant dense<0xFF800000> : vector<2x64xf32>
    %22 = vector.multi_reduction <maximumf>, %21, %cst_6 [1] : vector<2x7x64xf32> to vector<2x64xf32>
    %c0_7 = arith.constant 0 : index
    %c0_8 = arith.constant 0 : index
    %23 = vector.load %arg3[%c0_7, %c0_8] : memref<1x64xf32, #tpu.memory_space<vmem>>, vector<1x64xf32>
    %24 = vector.broadcast %23 : vector<1x64xf32> to vector<2x64xf32>
    %25 = arith.addf %22, %24 : vector<2x64xf32>
    %cst_9 = arith.constant 0.000000e+00 : f32
    %26 = vector.broadcast %cst_9 : f32 to vector<2x64xf32>
    %27 = arith.maximumf %25, %26 : vector<2x64xf32>
    %c0_10 = arith.constant 0 : index
    %c0_11 = arith.constant 0 : index
    %28 = vector.load %arg4[%c0_10, %c0_11] : memref<2x64xf32, #tpu.memory_space<vmem>>, vector<2x64xf32>
    tpu.vector_store %arg4[%c0_10, %c0_11], %27 {strides = array<i32>} : memref<2x64xf32, #tpu.memory_space<vmem>>, vector<2x64xf32>,
    return
  }
  func.func @transform_0(%arg0: i32) -> (i32, i32, i32) {
    %c0_i32 = arith.constant 0 : i32
    %c0_i32_0 = arith.constant 0 : i32
    %c0_i32_1 = arith.constant 0 : i32
    return %arg0, %c0_i32, %c0_i32_0 : i32, i32, i32
  }
  func.func @transform_1(%arg0: i32) -> (i32, i32) {
    %c0_i32 = arith.constant 0 : i32
    %c0_i32_0 = arith.constant 0 : i32
    %c0_i32_1 = arith.constant 0 : i32
    return %c0_i32, %c0_i32_0 : i32, i32
  }
  func.func @transform_2(%arg0: i32) -> (i32, i32) {
    %c0_i32 = arith.constant 0 : i32
    %c0_i32_0 = arith.constant 0 : i32
    %c0_i32_1 = arith.constant 0 : i32
    return %c0_i32, %c0_i32_0 : i32, i32
  }
  func.func @transform_3(%arg0: i32) -> (i32, i32) {
    %c0_i32 = arith.constant 0 : i32
    %c0_i32_0 = arith.constant 0 : i32
    return %arg0, %c0_i32 : i32, i32
  }
}

</mosaic_0001>

<bundles_post_ra>
// kernel: tpu_custom_call.1
= control target key start
LH: loop header
LB: loop body
LE: loop exit
PB: predicated region body
PF: predicated region fallthrough
CT: control target
= control target key end

     0   :  { %vm20_vm0 = vcmask 1043456   ;;  %s395_s0 = inlined_call_operand.vmem [shape: f32[2,8,32], index: 0, kind: input, shape index: {}]   ;;  %s396_s1 = inlined_call_operand.vmem [shape: bf16[96,64], index: 1, kind: input, shape index: {}]   ;;  %s397_s2 = inlined_call_operand.vmem [shape: f32[1,64], index: 2, kind: input, shape index: {}]   ;;  %s398_s3 = inlined_call_operand.hbm [shape: f32[2,64], index: 3, kind: output, shape index: {}]  }
   0x1   :  { %v17_v0 = vld [vmem:[%s395_s0 + $0x8] sm:$0xff]  ;;  %v16_v1 = vld [vmem:[%s395_s0] sm:$0xff] }
   0x2   :  { %v19_v2 = vpack.c.bf16 %v17_v0, %v17_v0  ;;  %v18_v3 = vpack.c.bf16 %v16_v1, %v16_v1 }
   0x3   :  { %8 = vsyncpa [#allocation3], 0  ;;  %s337_s16 = smov 32   ;;  %s338_s17 = smov 64   ;;  %v305_v16 = vld [vmem:[%s396_s1 + $0x28] sm:$0xff]  ;;  %v304_v17 = vld [vmem:[%s396_s1 + $0x20] sm:$0xff]  ;;  %v189_v44 = vlaneseq }
   0x4   :  { %v25_v4 = vsel %vm20_vm0, %v19_v2, 0  ;;  %v23_v5 = vsel %vm20_vm0, %v18_v3, 0  ;;  %163 = vmatpush.bf16.msra.mxu0 %v305_v16  ;;  %v303_v18 = vld [vmem:[%s396_s1 + $0x18] sm:$0xff]  ;;  %v302_v19 = vld [vmem:[%s396_s1 + $0x10] sm:$0xff]  ;;  %v301_v20 = vld [vmem:[%s396_s1 + $0x8] sm:$0xff]  ;;  %vm50_vm1 = vcmask 261120  }
   0x5   :  { %v32_v6 = vshrl.u32 %v25_v4, 16  ;;  %v34_v7 = vshll.u32 %v25_v4, 16  ;;  %v26_v8 = vshrl.u32 %v23_v5, 16  ;;  %v28_v9 = vshll.u32 %v23_v5, 16  ;;  %v300_v21 = vld [vmem:[%s396_s1] sm:$0xff]  ;;  %s340_s30 = smov [#allocation2]  }
   0x6   :  { %v45_v14 = vrot.slane %v25_v4, 1  ;;  %v44_v15 = vrot.slane %v23_v5, 1  ;;  %vm55_vm2 = vcmask 523264   ;;  %vm158_vm3 = vcmask 785408   ;;  %v310_v16 = vld [vmem:[%s397_s2] ss:$0 sm:$0xff] }
   0x7   :  { %v36_v10 = vrot.slane %v34_v7, 1  ;;  %v30_v11 = vrot.slane %v28_v9, 1  ;;  %v192_v51 = vand.u32 127, %v189_v44  ;;  %v190_v53 = vshrl.u32 %v189_v44, 7  ;;  %s260_s4 = sshll.u32 %s340_s30, 4  ;;  %s262_s7 = sshll.u32 %s398_s3, 4  ;;  %s261_s4 = int_to_ptr.vmem [resolvable:$true] %s260_s4  ;;  %s263_s7 = int_to_ptr.hbm [resolvable:$true] %s262_s7 }
   0x8   :  { %164 = vmatpush.bf16.msra.mxu0 %v304_v17  ;;  %v339_v55 = vmov 6   ;;  %vm224_vm6 = vcmask 522240   ;;  %vm250_vm7 = vcmask 1041409   ;;  %vm253_vm8 = vcmask 517120  }
   0x9   :  { %v37_v12 = vor.u32 %v36_v10, %v32_v6  ;;  %v31_v13 = vor.u32 %v30_v11, %v26_v8  ;;  %vm193_vm4 = vcmp.lt.s32.totalorder %v192_v51, 32 }
   0xa   :  { %v194_v56 = vsel %vm193_vm4, 7, %v339_v55 }
   0xb   :  { %40 = vrot.lane.b32.xlu0 %v37_v12, %s337_s16  ;;  %38 = vrot.lane.b32.xlu1 %v31_v13, %s337_s16  ;;  %vm195_vm5 = vcmp.lt.s32.totalorder %v190_v53, %v194_v56 }
   0xc   :  { %165 = vmatpush.bf16.msra.mxu0 %v303_v18 }
  0x10   :  { %166 = vmatpush.bf16.msra.mxu0 %v302_v19 }
  0x13   :  { %48 = vrot.lane.b32.xlu0 %v45_v14, %s338_s17  ;;  %46 = vrot.lane.b32.xlu1 %v44_v15, %s338_s17 }
  0x14   :  { %167 = vmatpush.bf16.msra.mxu0 %v301_v20 }
  0x18   :  { %168 = vmatpush.bf16.msra.mxu0 %v300_v21 }
  0x7d   :  { %v41_v22 = vpop.permute.xlu0 %40  ;;  %v39_v23 = vpop.permute.xlu1 %38 }
  0x7e   :  { %v54_v24 = vsel %vm50_vm1, %v25_v4, %v41_v22  ;;  %v52_v25 = vsel %vm50_vm1, %v23_v5, %v39_v23 }
  0x85   :  { %v49_v26 = vpop.permute.xlu0 %48  ;;  %v47_v27 = vpop.permute.xlu1 %46 }
  0x86   :  { %v59_v28 = vsel %vm55_vm2, %v54_v24, %v49_v26  ;;  %v57_v29 = vsel %vm55_vm2, %v52_v25, %v47_v27 }
  0x87   :  { %v77_v30 = vrot.slane %v59_v28, 1  ;;  %v78_v31 = vrot.slane %v59_v28, 2  ;;  %v88_v32 = vunpack.i.h.s16 %v59_v28  ;;  %102 = vst [vmem:[#allocation1] ss:$9 sm:$0xff] %v57_v29  ;;  %v74_v33 = vrot.slane %v57_v29, 1 }
  0x88   :  { %v75_v34 = vrot.slane %v57_v29, 2  ;;  %v76_v35 = vrot.slane %v57_v29, 3  ;;  %v79_v36 = vrot.slane %v59_v28, 3 }
  0x89   :  { %v90_v37 = vunpack.i.h.s16 %v77_v30  ;;  %v92_v38 = vunpack.i.h.s16 %v78_v31  ;;  %v272_v39 = vpack.i.b16 %v77_v30, %v88_v32  ;;  %105 = vst [vmem:[#allocation1 + $0x1] ss:$9 sm:$0xff] %v74_v33 }
  0x8a   :  { %v271_v42 = vpack.i.b16 %v59_v28, %v76_v35  ;;  %108 = vst [vmem:[#allocation1 + $0x2] ss:$9 sm:$0xff] %v75_v34 }
  0x8b   :  { %v273_v40 = vpack.i.b16 %v78_v31, %v90_v37  ;;  %v274_v41 = vpack.i.b16 %v79_v36, %v92_v38  ;;  %114 = vst [vmem:[#allocation1 + $0x4] ss:$9 sm:$0xff] %v272_v39 }
  0x8c   :  { %111 = vst [vmem:[#allocation1 + $0x3] ss:$9 sm:$0xff] %v271_v42 }
  0x8d   :  { %117 = vst [vmem:[#allocation1 + $0x5] ss:$9 sm:$0xff] %v273_v40 }
  0x8e   :  { %120 = vst [vmem:[#allocation1 + $0x6] ss:$9 sm:$0xff] %v274_v41 }
  0x95   :  { %v121_v43 = vld [vmem:[#allocation1] sm:$0xff] }
  0x96   :  { %299 = vmatmul.msk.bf16.vlgmr.msra.gmra.mxu0 %vm158_vm3, %v121_v43 }
 0x113   :  { %v170_v45 = vpop.f32.mrf.mxu0 }
 0x114   :  { %v178_v46 = vrot.slane %v170_v45, 2  ;;  %v179_v47 = vrot.slane %v170_v45, 3  ;;  %v180_v48 = vrot.slane %v170_v45, 4  ;;  %198 = vst [vmem:[#allocation1] ss:$9 sm:$0xff] %v170_v45  ;;  %v181_v49 = vrot.slane %v170_v45, 5 }
 0x115   :  { %v182_v50 = vrot.slane %v170_v45, 6  ;;  %v177_v52 = vrot.slane %v170_v45, 1  ;;  %v183_v1 = vrot.slane %v170_v45, 7 }
 0x116   :  { %202 = vst [vmem:[#allocation1 + $0x2] ss:$9 sm:$0xff] %v178_v46 }
 0x117   :  { %204 = vst [vmem:[#allocation1 + $0x3] ss:$9 sm:$0xff] %v179_v47 }
 0x118   :  { %206 = vst [vmem:[#allocation1 + $0x4] ss:$9 sm:$0xff] %v180_v48 }
 0x119   :  { %208 = vst [vmem:[#allocation1 + $0x5] ss:$9 sm:$0xff] %v181_v49 }
 0x11a   :  { %210 = vst [vmem:[#allocation1 + $0x6] ss:$9 sm:$0xff] %v182_v50 }
 0x11b   :  { %200 = vst [vmem:[#allocation1 + $0x1] ss:$9 sm:$0xff] %v177_v52  ;;  %v172_v54 = vpop.f32.mrf.mxu0 }
 0x11c   :  { %v184_v57 = vrot.slane %v172_v54, 1  ;;  %v185_v58 = vrot.slane %v172_v54, 2  ;;  %v186_v59 = vrot.slane %v172_v54, 3  ;;  %v187_v61 = vrot.slane %v172_v54, 4 }
 0x11d   :  { %v188_v63 = vrot.slane %v172_v54, 5 }
 0x122   :  { %v211_v60 = vld [vmem:[#allocation1] sm:$0xff] }
 0x123   :  { %213 = vst [vmem:[#allocation1 + $0x1] ss:$9 sm:$0xff] %v172_v54  ;;  %v222_v62 = vsel %vm195_vm5, %v211_v60, -inf }
 0x124   :  { %214 = vst [vmem:[#allocation1 + $0x2] ss:$9 sm:$0xff] %v184_v57  ;;  %v225_v0 = vsel %vm224_vm6, %v222_v62, -inf }
 0x125   :  { %215 = vst [vmem:[#allocation1 + $0x3] ss:$9 sm:$0xff] %v185_v58  ;;  %v226_v2 = vrot.slane %v225_v0, 4 }
 0x126   :  { %216 = vst [vmem:[#allocation1 + $0x4] ss:$9 sm:$0xff] %v186_v59 }
 0x127   :  { %217 = vst [vmem:[#allocation1 + $0x5] ss:$9 sm:$0xff] %v187_v61  ;;  %v227_v3 = vmax.f32 %v225_v0, %v226_v2 }
 0x128   :  { %218 = vst [vmem:[#allocation1 + $0x6] ss:$9 sm:$0xff] %v188_v63 }
 0x129   :  { %212 = vst [vmem:[#allocation1] ss:$9 sm:$0xff] %v183_v1  ;;  %v228_v4 = vrot.slane %v227_v3, 2 }
 0x12b   :  { %v229_v8 = vmax.f32 %v227_v3, %v228_v4 }
 0x12d   :  { %v230_v11 = vrot.slane %v229_v8, 1 }
 0x12f   :  { %v231_v14 = vmax.f32 %v229_v8, %v230_v11 }
 0x130   :  { %v219_v5 = vld [vmem:[#allocation1] sm:$0xff] }
 0x131   :  { %v223_v6 = vsel %vm195_vm5, %v219_v5, -inf  ;;  %v243_v18 = vadd.f32 %v310_v16, %v231_v14 }
 0x132   :  { %v232_v7 = vsel %vm224_vm6, %v223_v6, -inf }
 0x133   :  { %v233_v9 = vrot.slane %v232_v7, 4  ;;  %v245_v21 = vmax.f32 %v243_v18, 0.0 }
 0x135   :  { %v234_v10 = vmax.f32 %v232_v7, %v233_v9 }
 0x137   :  { %v235_v12 = vrot.slane %v234_v10, 2 }
 0x139   :  { %v236_v13 = vmax.f32 %v234_v10, %v235_v12 }
 0x13b   :  { %v237_v15 = vrot.slane %v236_v13, 1 }
 0x13d   :  { %v238_v17 = vmax.f32 %v236_v13, %v237_v15 }
 0x13f   :  { %v244_v19 = vadd.f32 %v310_v16, %v238_v17 }
 0x141   :  { %v246_v20 = vmax.f32 %v244_v19, 0.0 }
 0x143   :  { %v249_v22 = vrot.slane %v246_v20, 7 }
 0x145   :  { %v251_v23 = vsel %vm250_vm7, %v249_v22, %v245_v21 }
 0x146   :  { %254 = vst.msk [vmem:[#allocation2] sm:$0x3] %vm253_vm8, %v251_v23 }
 0x147   :  { %265 = dma.vmem_to_hbm [thread:$0]  %s261_s4, 32, %s263_s7, [#allocation3]  }
 0x148   :  { %335 = dma.done.wait [#allocation3], 32  }
 0x149   :  { %336 = vsyncadd [#allocation3], 4294967264 }
 0x14a   :  { %270 = vsyncpa [#allocation3], 1 }

</bundles_post_ra>
